<compile_context>
chip_gen: v7x
topology: tpu7x:2x2x1
jax: 0.10.0
libtpu: 0.0.40
codegen_flags: <defaults>
</compile_context>

<pallas_src>
import functools

import jax
import jax.numpy as jnp
from jax.experimental import pallas as pl
from jax.experimental.pallas import tpu as pltpu

_LANES = 128
_SUBLANES = 8
_MAX_BLOCK_ROWS = 1024  # 1024 x 128 x 4B = 512 KiB per input tile


def _focal_pow(x, gamma):
    """(1 - p_t) ** gamma with cheap special cases (avoid generic exp/log pow)."""
    if gamma == 0.0:
        return jnp.ones_like(x)
    if gamma == 0.5:
        return jnp.sqrt(x)
    if gamma == 1.0:
        return x
    if gamma == 1.5:
        return x * jnp.sqrt(x)
    if gamma == 2.0:
        return x * x
    if float(gamma).is_integer() and 0.0 < gamma <= 4.0:
        r = x
        for _ in range(int(gamma) - 1):
            r = r * x
        return r
    return x ** gamma


def _focal_elementwise(p, t, alpha, gamma):
    """Exact PyTorch semantics: BCE (log clamped at -100) * (1-p_t)^gamma * alpha_t."""
    p = p.astype(jnp.float32)
    t = t.astype(jnp.float32)
    log_p = jnp.maximum(jnp.log(p), -100.0)
    log_1mp = jnp.maximum(jnp.log(1.0 - p), -100.0)
    ce = -(t * log_p + (1.0 - t) * log_1mp)
    p_t = p * t + (1.0 - p) * (1.0 - t)
    loss = ce * _focal_pow(1.0 - p_t, gamma)
    if alpha >= 0:
        alpha_t = alpha * t + (1.0 - alpha) * (1.0 - t)
        loss = alpha_t * loss
    return loss


def _focal_none_kernel(p_ref, t_ref, o_ref, *, alpha, gamma):
    o_ref[...] = _focal_elementwise(p_ref[...], t_ref[...], alpha, gamma)


def _focal_partial_sum_kernel(p_ref, t_ref, out_ref, *, alpha, gamma,
                              block_rows, total_rows, needs_mask):
    loss = _focal_elementwise(p_ref[...], t_ref[...], alpha, gamma)

    if needs_mask:
        # Ragged last block: rows >= total_rows are garbage reads -> zero them.
        i = pl.program_id(0)
        row_ids = jax.lax.broadcasted_iota(jnp.int32, loss.shape, 0)
        loss = jnp.where(i * block_rows + row_ids < total_rows, loss, 0.0)

    # Reduce the (block_rows, 128) tile to a single (8, 128) vreg on the VPU
    # (vreg-wise adds; no per-step cross-lane reduce, no SMEM scalar round-trip).
    r = loss.shape[0]
    pad_r = (-r) % _SUBLANES
    if pad_r:  # only possible for tiny inputs (rows < 8*k)
        loss = jnp.concatenate(
            [loss, jnp.zeros((pad_r, _LANES), jnp.float32)], axis=0)
    partial = jnp.sum(loss.reshape(-1, _SUBLANES, _LANES), axis=0)
    out_ref[...] = partial.reshape(1, _SUBLANES, _LANES)


def _as_lane_slab(x):
    """Flatten to (rows, 128). Pads (copies) only when numel % 128 != 0.

    Zero-padding (p=0, t=0) yields exactly loss==0 (log clamped at -100,
    ce==0, p_t==1), so padded lanes never perturb sums.
    """
    flat = x.reshape(-1)
    n = flat.shape[0]
    pad = (-n) % _LANES
    if pad:
        flat = jnp.pad(flat, (0, pad))
    return flat.reshape(-1, _LANES), n, pad


def focal_loss(predictions, targets, alpha=0.25, gamma=1.5, reduction="mean"):
    assert predictions.shape == targets.shape
    if reduction not in ("none", "mean", "sum"):
        raise ValueError(
            f"Invalid Value for arg 'reduction': '{reduction}' "
            "\n Supported reduction modes: 'none', 'mean', 'sum'")
    orig_shape = predictions.shape

    p2d, n_elems, lane_pad = _as_lane_slab(predictions.astype(jnp.float32))
    t2d, _, _ = _as_lane_slab(targets.astype(jnp.float32))
    rows = p2d.shape[0]

    block_rows = min(_MAX_BLOCK_ROWS, rows)
    num_blocks = pl.cdiv(rows, block_rows)
    needs_mask = (rows % block_rows) != 0

    in_specs = [
        pl.BlockSpec((block_rows, _LANES), lambda i: (i, 0)),
        pl.BlockSpec((block_rows, _LANES), lambda i: (i, 0)),
    ]

    if reduction == "none":
        kernel = functools.partial(_focal_none_kernel, alpha=alpha, gamma=gamma)
        out2d = pl.pallas_call(
            kernel,
            out_shape=jax.ShapeDtypeStruct((rows, _LANES), jnp.float32),
            grid_spec=pltpu.PrefetchScalarGridSpec(
                num_scalar_prefetch=0,
                grid=(num_blocks,),
                in_specs=in_specs,
                out_specs=pl.BlockSpec((block_rows, _LANES), lambda i: (i, 0)),
            ),
            compiler_params=pltpu.CompilerParams(
                dimension_semantics=("parallel",)),
        )(p2d, t2d)
        if lane_pad:
            return out2d.reshape(-1)[:n_elems].reshape(orig_shape)
        return out2d.reshape(orig_shape)  # free: layout-preserving reshape

    kernel = functools.partial(
        _focal_partial_sum_kernel, alpha=alpha, gamma=gamma,
        block_rows=block_rows, total_rows=rows, needs_mask=needs_mask)
    partials = pl.pallas_call(
        kernel,
        out_shape=jax.ShapeDtypeStruct(
            (num_blocks, _SUBLANES, _LANES), jnp.float32),
        grid_spec=pltpu.PrefetchScalarGridSpec(
            num_scalar_prefetch=0,
            grid=(num_blocks,),
            in_specs=in_specs,
            out_specs=pl.BlockSpec(
                (1, _SUBLANES, _LANES), lambda i: (i, 0, 0)),
        ),
        compiler_params=pltpu.CompilerParams(
            dimension_semantics=("parallel",)),
    )(p2d, t2d)

    total = jnp.sum(partials)
    if reduction == "mean":
        return total / jnp.float32(n_elems)
    return total


def _reference(predictions, targets, alpha=0.25, gamma=1.5, reduction="mean"):
    """Pure-JAX reference with the generic pow (checks the sqrt special case)."""
    p = predictions.astype(jnp.float32)
    t = targets.astype(jnp.float32)
    log_p = jnp.maximum(jnp.log(p), -100.0)
    log_1mp = jnp.maximum(jnp.log(1.0 - p), -100.0)
    ce = -(t * log_p + (1.0 - t) * log_1mp)
    p_t = p * t + (1.0 - p) * (1.0 - t)
    loss = ce * (1.0 - p_t) ** gamma
    if alpha >= 0:
        alpha_t = alpha * t + (1.0 - alpha) * (1.0 - t)
        loss = alpha_t * loss
    if reduction == "mean":
        return loss.mean()
    if reduction == "sum":
        return loss.sum()
    return loss


if __name__ == "__main__":
    key = jax.random.PRNGKey(0)

    # (shape, tolerances) — first one matches the module's expected usage;
    # the others exercise lane-padding and the ragged/masked multi-block path.
    test_shapes = [
        (2, 4, 16, 16),    # 2048 elems, single block, no pad, no mask
        (3, 5, 7, 9),      # 945 elems, lane-pad path
        (2, 4, 144, 144),  # 165888 elems -> rows=1296 > 1024: 2 blocks, masked tail
    ]

    ok = True
    for shape in test_shapes:
        key, kp, kt = jax.random.split(key, 3)
        predictions = jax.random.uniform(
            kp, shape, jnp.float32, 1e-4, 1.0 - 1e-4)
        targets = jax.random.bernoulli(kt, 0.3, shape).astype(jnp.float32)

        out_mean = focal_loss(predictions, targets, reduction="mean")
        out_sum = focal_loss(predictions, targets, reduction="sum")
        out_none = focal_loss(predictions, targets, reduction="none")
        jax.block_until_ready((out_mean, out_sum, out_none))

        ref_mean = _reference(predictions, targets, reduction="mean")
        ref_sum = _reference(predictions, targets, reduction="sum")
        ref_none = _reference(predictions, targets, reduction="none")

        ok &= bool(jnp.allclose(out_mean, ref_mean, rtol=1e-5, atol=1e-6))
        ok &= bool(jnp.allclose(out_sum, ref_sum, rtol=1e-5, atol=1e-4))
        ok &= bool(jnp.allclose(out_none, ref_none, rtol=1e-5, atol=1e-6))
        ok &= out_none.shape == shape

    assert ok
    print("KERNEL_OK")
</pallas_src>

<mosaic_0001>
module attributes {stable_mosaic.version = 11 : i64} {
  func.func @_focal_partial_sum_kernel(%arg0: i32, %arg1: memref<16x128xf32, #tpu.memory_space<vmem>>, %arg2: memref<16x128xf32, #tpu.memory_space<vmem>>, %arg3: memref<1x8x128xf32, #tpu.memory_space<vmem>>) attributes {dimension_semantics = [#tpu.dimension_semantics<parallel>], iteration_bounds = array<i64: 1>, scalar_prefetch = 0 : i64, scratch_operands = 0 : i64, tpu.core_type = #tpu.core_type<tc>, window_params = [{transform_indices = @transform_0, window_bounds = array<i64: 16, 128>}, {transform_indices = @transform_1, window_bounds = array<i64: 16, 128>}, {transform_indices = @transform_2, window_bounds = array<i64: 1, 8, 128>}]} {
    %c0 = arith.constant 0 : index
    %c0_0 = arith.constant 0 : index
    %0 = vector.load %arg1[%c0, %c0_0] : memref<16x128xf32, #tpu.memory_space<vmem>>, vector<16x128xf32>
    %c0_1 = arith.constant 0 : index
    %c0_2 = arith.constant 0 : index
    %1 = vector.load %arg2[%c0_1, %c0_2] : memref<16x128xf32, #tpu.memory_space<vmem>>, vector<16x128xf32>
    %2 = math.log %0 : vector<16x128xf32>
    %cst = arith.constant -1.000000e+02 : f32
    %3 = vector.broadcast %cst : f32 to vector<16x128xf32>
    %4 = arith.maximumf %2, %3 : vector<16x128xf32>
    %cst_3 = arith.constant 1.000000e+00 : f32
    %5 = vector.broadcast %cst_3 : f32 to vector<16x128xf32>
    %6 = arith.subf %5, %0 : vector<16x128xf32>
    %7 = math.log %6 : vector<16x128xf32>
    %cst_4 = arith.constant -1.000000e+02 : f32
    %8 = vector.broadcast %cst_4 : f32 to vector<16x128xf32>
    %9 = arith.maximumf %7, %8 : vector<16x128xf32>
    %10 = arith.mulf %1, %4 : vector<16x128xf32>
    %cst_5 = arith.constant 1.000000e+00 : f32
    %11 = vector.broadcast %cst_5 : f32 to vector<16x128xf32>
    %12 = arith.subf %11, %1 : vector<16x128xf32>
    %13 = arith.mulf %12, %9 : vector<16x128xf32>
    %14 = arith.addf %10, %13 : vector<16x128xf32>
    %cst_6 = arith.constant 0.000000e+00 : f32
    %15 = vector.broadcast %cst_6 : f32 to vector<16x128xf32>
    %16 = arith.subf %15, %14 : vector<16x128xf32>
    %17 = arith.mulf %0, %1 : vector<16x128xf32>
    %cst_7 = arith.constant 1.000000e+00 : f32
    %18 = vector.broadcast %cst_7 : f32 to vector<16x128xf32>
    %19 = arith.subf %18, %0 : vector<16x128xf32>
    %cst_8 = arith.constant 1.000000e+00 : f32
    %20 = vector.broadcast %cst_8 : f32 to vector<16x128xf32>
    %21 = arith.subf %20, %1 : vector<16x128xf32>
    %22 = arith.mulf %19, %21 : vector<16x128xf32>
    %23 = arith.addf %17, %22 : vector<16x128xf32>
    %cst_9 = arith.constant 1.000000e+00 : f32
    %24 = vector.broadcast %cst_9 : f32 to vector<16x128xf32>
    %25 = arith.subf %24, %23 : vector<16x128xf32>
    %26 = math.sqrt %25 : vector<16x128xf32>
    %27 = arith.mulf %25, %26 : vector<16x128xf32>
    %28 = arith.mulf %16, %27 : vector<16x128xf32>
    %cst_10 = arith.constant 2.500000e-01 : f32
    %29 = vector.broadcast %cst_10 : f32 to vector<16x128xf32>
    %30 = arith.mulf %29, %1 : vector<16x128xf32>
    %cst_11 = arith.constant 1.000000e+00 : f32
    %31 = vector.broadcast %cst_11 : f32 to vector<16x128xf32>
    %32 = arith.subf %31, %1 : vector<16x128xf32>
    %cst_12 = arith.constant 7.500000e-01 : f32
    %33 = vector.broadcast %cst_12 : f32 to vector<16x128xf32>
    %34 = arith.mulf %33, %32 : vector<16x128xf32>
    %35 = arith.addf %30, %34 : vector<16x128xf32>
    %36 = arith.mulf %35, %28 : vector<16x128xf32>
    %37 = vector.shape_cast %36 : vector<16x128xf32> to vector<2x8x128xf32>
    %cst_13 = arith.constant dense<0.000000e+00> : vector<8x128xf32>
    %38 = vector.multi_reduction <add>, %37, %cst_13 [0] : vector<2x8x128xf32> to vector<8x128xf32>
    %39 = vector.shape_cast %38 : vector<8x128xf32> to vector<1x8x128xf32>
    %c0_14 = arith.constant 0 : index
    %c0_15 = arith.constant 0 : index
    %c0_16 = arith.constant 0 : index
    %40 = vector.load %arg3[%c0_14, %c0_15, %c0_16] : memref<1x8x128xf32, #tpu.memory_space<vmem>>, vector<1x8x128xf32>
    tpu.vector_store %arg3[%c0_14, %c0_15, %c0_16], %39 {strides = array<i32>} : memref<1x8x128xf32, #tpu.memory_space<vmem>>, vector<1x8x128xf32>,
    return
  }
  func.func @transform_0(%arg0: i32) -> (i32, i32) {
    %c0_i32 = arith.constant 0 : i32
    %c0_i32_0 = arith.constant 0 : i32
    return %arg0, %c0_i32 : i32, i32
  }
  func.func @transform_1(%arg0: i32) -> (i32, i32) {
    %c0_i32 = arith.constant 0 : i32
    %c0_i32_0 = arith.constant 0 : i32
    return %arg0, %c0_i32 : i32, i32
  }
  func.func @transform_2(%arg0: i32) -> (i32, i32, i32) {
    %c0_i32 = arith.constant 0 : i32
    %c0_i32_0 = arith.constant 0 : i32
    %c0_i32_1 = arith.constant 0 : i32
    return %arg0, %c0_i32, %c0_i32_0 : i32, i32, i32
  }
}

</mosaic_0001>

<bundles_post_ra>
// kernel: tpu_custom_call.1
= control target key start
LH: loop header
LB: loop body
LE: loop exit
PB: predicated region body
PF: predicated region fallthrough
CT: control target
= control target key end

     0   :  { %7 = vsyncpa [#allocation3], 0  ;;  %s265_s0 = inlined_call_operand.hbm [shape: f32[16,128], index: 0, kind: input, shape index: {}]   ;;  %s266_s1 = inlined_call_operand.hbm [shape: f32[16,128], index: 1, kind: input, shape index: {}]   ;;  %s267_s2 = inlined_call_operand.hbm [shape: f32[1,8,128], index: 2, kind: output, shape index: {}]  }
   0x1   :  { %8 = vsyncpa [#allocation6], 0 }
   0x2   :  { %9 = vsyncpa [#allocation4], 0  ;;  %s209_s9 = smov [#allocation2]   ;;  %s137_s13 = scalar_lea.hbm %s265_s0, 256 }
   0x3   :  { %s15_s10 = sshll.u32 %s209_s9, 4  ;;  %p138_p0 = scmp.ne.s32.totalorder %s265_s0, %s137_s13  ;;  %s16_s10 = int_to_ptr.vmem [resolvable:$true] %s15_s10 }
   0x4   :  { %p141_p1 = scmp.lt.u32.totalorder %s137_s13, %s265_s0 }
   0x6   :  { %p143_p2 = pnand %p141_p1, %p138_p0 }
   0x8   :  { %146 = shalt.err (!%p143_p2)
}
   0x9   :  { %s147_s18 = scalar_lea.vmem %s16_s10, 256  ;;  %p152_p4 = scmp.lt.s32.totalorder %s16_s10, %s16_s10 }
   0xa   :  { %p148_p3 = scmp.ne.s32.totalorder %s16_s10, %s147_s18  ;;  %p153_p5 = scmp.lt.s32.totalorder %s147_s18, %s147_s18 }
   0xc   :  { %p154_p6 = por %p153_p5, %p152_p4 }
   0xe   :  { %p155_p7 = pnand %p154_p6, %p148_p3 }
  0x10   :  { %158 = shalt.err (!%p155_p7)
}
  0x11   :  { %s210_s19 = smov 128   ;;  %s211_s20 = smov 8  }
  0x12   :  { %21 = dma.hbm_to_vmem [thread:$0]  %s265_s0, 256, %s16_s10, [#allocation3], %s210_s19, %s210_s19, %s211_s20  }
  0x13   :  { %s212_s23 = smov [#allocation5]   ;;  %s159_s27 = scalar_lea.hbm %s266_s1, 256 }
  0x14   :  { %s27_s24 = sshll.u32 %s212_s23, 4  ;;  %p160_p8 = scmp.ne.s32.totalorder %s266_s1, %s159_s27  ;;  %s28_s24 = int_to_ptr.vmem [resolvable:$true] %s27_s24 }
  0x15   :  { %p163_p9 = scmp.lt.u32.totalorder %s159_s27, %s266_s1 }
  0x17   :  { %p165_p10 = pnand %p163_p9, %p160_p8 }
  0x19   :  { %168 = shalt.err (!%p165_p10)
}
  0x1a   :  { %s169_s4 = scalar_lea.vmem %s28_s24, 256  ;;  %p174_p12 = scmp.lt.s32.totalorder %s28_s24, %s28_s24 }
  0x1b   :  { %p170_p11 = scmp.ne.s32.totalorder %s28_s24, %s169_s4  ;;  %p175_p13 = scmp.lt.s32.totalorder %s169_s4, %s169_s4 }
  0x1d   :  { %p176_p0 = por %p175_p13, %p174_p12 }
  0x1f   :  { %p177_p1 = pnand %p176_p0, %p170_p11 }
  0x21   :  { %180 = shalt.err (!%p177_p1)
}
  0x22   :  { %33 = dma.hbm_to_vmem [thread:$0]  %s266_s1, 256, %s28_s24, [#allocation6], %s210_s19, %s210_s19, %s211_s20  }
  0x23   :  { %203 = dma.done.wait [#allocation3], 256  }
  0x24   :  { %204 = vsyncadd [#allocation3], 4294967040 }
  0x25   :  { %205 = dma.done.wait [#allocation6], 256  }
  0x26   :  { %206 = vsyncadd [#allocation6], 4294967040  ;;  %v40_v0 = vld [vmem:[#allocation2] sm:$0xff]  ;;  %v41_v1 = vld [vmem:[#allocation2 + $0x8] sm:$0xff]  ;;  %s213_s1 = smov [#allocation7]  }
  0x27   :  { %v42_v2 = vld [vmem:[#allocation5] sm:$0xff]  ;;  %v43_v3 = vld [vmem:[#allocation5 + $0x8] sm:$0xff]  ;;  %125 = vlog2.f32 %v40_v0  ;;  %v50_v4 = vsub.f32 1.0, %v40_v0  ;;  %v51_v5 = vsub.f32 1.0, %v41_v1  ;;  %s110_s6 = sshll.u32 %s213_s1, 4  ;;  %s111_s6 = int_to_ptr.vmem [resolvable:$true] %s110_s6 }
  0x28   :  { %v60_v6 = vsub.f32 1.0, %v42_v2  ;;  %127 = vlog2.f32 %v41_v1  ;;  %v61_v7 = vsub.f32 1.0, %v43_v3  ;;  %v68_v8 = vmul.f32 %v42_v2, %v40_v0  ;;  %s181_s7 = scalar_lea.vmem %s111_s6, 128  ;;  %p186_p3 = scmp.lt.s32.totalorder %s111_s6, %s111_s6 }
  0x29   :  { %v69_v9 = vmul.f32 %v43_v3, %v41_v1  ;;  %129 = vlog2.f32 %v50_v4  ;;  %v94_v31 = vmul.f32 0.25, %v42_v2  ;;  %v95_v32 = vmul.f32 0.25, %v43_v3  ;;  %p182_p2 = scmp.ne.s32.totalorder %s111_s6, %s181_s7  ;;  %p187_p4 = scmp.lt.s32.totalorder %s181_s7, %s181_s7 }
  0x2a   :  { %v70_v10 = vmul.f32 %v60_v6, %v50_v4  ;;  %131 = vlog2.f32 %v51_v5  ;;  %v71_v11 = vmul.f32 %v61_v7, %v51_v5  ;;  %v96_v33 = vmul.f32 0.75, %v60_v6 }
  0x2b   :  { %v97_v43 = vmul.f32 0.75, %v61_v7  ;;  %p188_p5 = por %p187_p4, %p186_p3 }
  0x2c   :  { %v72_v12 = vadd.f32 %v70_v10, %v68_v8  ;;  %v73_v13 = vadd.f32 %v71_v11, %v69_v9  ;;  %v98_v51 = vadd.f32 %v96_v33, %v94_v31 }
  0x2d   :  { %v99_v53 = vadd.f32 %v97_v43, %v95_v32  ;;  %p189_p6 = pnand %p188_p5, %p182_p2 }
  0x2e   :  { %v74_v14 = vsub.f32 1.0, %v72_v12  ;;  %v75_v15 = vsub.f32 1.0, %v73_v13 }
  0x30   :  { %133 = vrsqrt.f32 %v74_v14  ;;  %vm78_vm0 = vcmp.eq.f32.partialorder %v74_v14, inf  ;;  %vm80_vm1 = vcmp.eq.f32.partialorder %v74_v14, 0.0  ;;  %v81_v36 = vand.u32 2147483648, %v74_v14 }
  0x31   :  { %135 = vrsqrt.f32 %v75_v15  ;;  %v126_v16 = vpop.eup %125  ;;  %vm85_vm2 = vcmp.eq.f32.partialorder %v75_v15, inf  ;;  %v88_v40 = vand.u32 2147483648, %v75_v15  ;;  %vm87_vm3 = vcmp.eq.f32.partialorder %v75_v15, 0.0 }
  0x32   :  { %v128_v17 = vpop.eup %127  ;;  %v45_v18 = vmul.f32 0.6931472, %v126_v16 }
  0x33   :  { %v130_v19 = vpop.eup %129  ;;  %v47_v20 = vmul.f32 0.6931472, %v128_v17 }
  0x34   :  { %v132_v21 = vpop.eup %131  ;;  %v48_v22 = vmax.f32 %v45_v18, -100.0  ;;  %v53_v23 = vmul.f32 0.6931472, %v130_v19 }
  0x35   :  { %v49_v24 = vmax.f32 %v47_v20, -100.0  ;;  %v55_v25 = vmul.f32 0.6931472, %v132_v21 }
  0x36   :  { %v56_v26 = vmax.f32 %v53_v23, -100.0  ;;  %v58_v27 = vmul.f32 %v48_v22, %v42_v2 }
  0x37   :  { %v57_v28 = vmax.f32 %v55_v25, -100.0  ;;  %v59_v29 = vmul.f32 %v49_v24, %v43_v3 }
  0x38   :  { %v62_v30 = vmul.f32 %v60_v6, %v56_v26 }
  0x39   :  { %v63_v35 = vmul.f32 %v61_v7, %v57_v28 }
  0x3a   :  { %v134_v34 = vpop.eup %133  ;;  %v64_v38 = vadd.f32 %v62_v30, %v58_v27 }
  0x3b   :  { %v136_v37 = vpop.eup %135  ;;  %v77_v39 = vmul.f32 %v134_v34, %v74_v14  ;;  %v65_v41 = vadd.f32 %v63_v35, %v59_v29 }
  0x3c   :  { %v84_v42 = vmul.f32 %v136_v37, %v75_v15  ;;  %v66_v44 = vsub.f32 0.0, %v64_v38 }
  0x3d   :  { %v79_v45 = vsel %vm78_vm0, %v74_v14, %v77_v39  ;;  %v67_v46 = vsub.f32 0.0, %v65_v41 }
  0x3e   :  { %v82_v47 = vsel %vm80_vm1, %v81_v36, %v79_v45  ;;  %v86_v48 = vsel %vm85_vm2, %v75_v15, %v84_v42 }
  0x3f   :  { %v89_v49 = vsel %vm87_vm3, %v88_v40, %v86_v48  ;;  %v90_v50 = vmul.f32 %v82_v47, %v74_v14 }
  0x40   :  { %v91_v52 = vmul.f32 %v89_v49, %v75_v15 }
  0x41   :  { %v92_v54 = vmul.f32 %v90_v50, %v66_v44 }
  0x42   :  { %v93_v55 = vmul.f32 %v91_v52, %v67_v46 }
  0x43   :  { %v100_v56 = vmul.f32 %v98_v51, %v92_v54 }
  0x44   :  { %v101_v57 = vmul.f32 %v99_v53, %v93_v55 }
  0x46   :  { %v102_v58 = vadd.f32 %v101_v57, %v100_v56 }
  0x48   :  { %103 = vst [vmem:[#allocation7] sm:$0xff] %v102_v58 }
  0x49   :  { %192 = shalt.err (!%p189_p6)
}
  0x4a   :  { %s193_s10 = scalar_lea.hbm %s267_s2, 128 }
  0x4b   :  { %p194_p7 = scmp.ne.s32.totalorder %s267_s2, %s193_s10  ;;  %p197_p8 = scmp.lt.u32.totalorder %s193_s10, %s267_s2 }
  0x4d   :  { %p199_p9 = pnand %p197_p8, %p194_p7 }
  0x4f   :  { %202 = shalt.err (!%p199_p9)
}
  0x50   :  { %113 = dma.vmem_to_hbm [thread:$0]  %s111_s6, 128, %s267_s2, [#allocation4]  }
  0x51   :  { %207 = dma.done.wait [#allocation4], 128  }
  0x52   :  { %208 = vsyncadd [#allocation4], 4294967168 }
  0x53   :  { %117 = vsyncpa [#allocation3], 1 }
  0x54   :  { %118 = vsyncpa [#allocation6], 1 }
  0x55   :  { %119 = vsyncpa [#allocation4], 1 }

</bundles_post_ra>
